<compile_context>
chip_gen: v7x
topology: tpu7x:2x2x1
jax: 0.10.0
libtpu: 0.0.40
codegen_flags: <defaults>
</compile_context>

<pallas_src>
import jax
import jax.numpy as jnp
from jax.experimental import pallas as pl
from jax.experimental.pallas import tpu as pltpu

LANE = 128
BN_EPS = 1e-5
NEG_BIG = -1e30  # bias for padded logit columns (kills them in the log-softmax)


def gcnjk_kernel(x_ref, a_ref, w1_ref, g1_ref, be1_ref,
                 w2_ref, b2_ref, wf_ref, bf_ref, out_ref):
    bf16 = jnp.bfloat16
    x_b = x_ref[...].astype(bf16)
    a_b = a_ref[...].astype(bf16)

    # ---- GCNConv 1: A @ (X @ W1)   (b1 omitted: exactly cancelled by BN mean-sub) ----
    xw = jnp.dot(x_b, w1_ref[...].astype(bf16), preferred_element_type=jnp.float32)
    h = jnp.dot(a_b, xw.astype(bf16), preferred_element_type=jnp.float32)

    # ---- BatchNorm1d (batch statistics over node axis), sums via MXU ----
    n = h.shape[0]
    ones8 = jnp.ones((8, n), dtype=jnp.float32)  # sublane-aligned ones block (rows identical)
    s1 = jnp.dot(ones8, h, preferred_element_type=jnp.float32)[0:1, :]
    s2 = jnp.dot(ones8, h * h, preferred_element_type=jnp.float32)[0:1, :]
    inv_n = 1.0 / n
    mean = s1 * inv_n
    var = jnp.maximum(s2 * inv_n - mean * mean, 0.0)
    scale = g1_ref[...] * jax.lax.rsqrt(var + BN_EPS)       # fold BN affine into scale/shift
    shift = be1_ref[...] - mean * scale
    h1 = jnp.maximum(h * scale + shift, 0.0)                 # BN + ReLU in one pass over h

    # (dropout == identity: eval semantics)

    # ---- GCNConv 2: A @ (h1 @ W2) + b2 ----
    hw = jnp.dot(h1.astype(bf16), w2_ref[...].astype(bf16),
                 preferred_element_type=jnp.float32)
    h2 = jnp.dot(a_b, hw.astype(bf16), preferred_element_type=jnp.float32) + b2_ref[...]

    # ---- JumpingKnowledge 'max' + final Linear ----
    jk = jnp.maximum(h1, h2)
    z = jnp.dot(jk.astype(bf16), wf_ref[...].astype(bf16),
                preferred_element_type=jnp.float32) + bf_ref[...]

    # ---- log_softmax over classes (padded columns carry a -1e30 bias -> exp == 0) ----
    z_max = jnp.max(z, axis=1, keepdims=True)
    zs = z - z_max
    lse = jnp.log(jnp.sum(jnp.exp(zs), axis=1, keepdims=True))
    out_ref[...] = zs - lse


def _pad2(a, rows, cols):
    return jnp.pad(a, ((0, rows - a.shape[0]), (0, cols - a.shape[1])))


def _round_up(v, m):
    return ((v + m - 1) // m) * m


def gcnjk_forward(x, A, params):
    N, IN = x.shape
    HID = params["w1"].shape[1]
    C = params["wf"].shape[1]
    IN_P = _round_up(IN, LANE)
    HID_P = _round_up(HID, LANE)
    OUT_P = _round_up(C, LANE)

    # lane-dense (128-multiple) parameter packing; zero padding is exact for the matmuls
    x_p = _pad2(x, N, IN_P)
    w1_p = _pad2(params["w1"], IN_P, HID_P)
    g1_p = _pad2(params["g1"], 1, HID_P)
    be1_p = _pad2(params["be1"], 1, HID_P)
    w2_p = _pad2(params["w2"], HID_P, HID_P)
    b2_p = _pad2(params["b2"], 1, HID_P)
    wf_p = _pad2(params["wf"], HID_P, OUT_P)
    # padded logit columns must not contribute to the log-softmax reduction
    bf_p = jnp.full((1, OUT_P), NEG_BIG, dtype=jnp.float32).at[:, :C].set(params["bf"])

    vmem = pl.BlockSpec(memory_space=pltpu.MemorySpace.VMEM)

    flops = 2 * (N * IN_P * HID_P          # X @ W1
                 + N * N * HID_P           # A @ xw
                 + 2 * 8 * N * HID_P       # BN sum / sum-of-squares matmuls
                 + N * HID_P * HID_P       # h1 @ W2
                 + N * N * HID_P           # A @ hw
                 + N * HID_P * OUT_P)      # jk @ Wf
    bytes_accessed = 4 * (N * IN_P + N * N + IN_P * HID_P + HID_P * HID_P
                          + HID_P * OUT_P + 4 * HID_P + OUT_P + N * OUT_P)
    cost = pl.CostEstimate(flops=flops,
                           transcendentals=N * OUT_P + N + HID_P,
                           bytes_accessed=bytes_accessed)

    out_p = pl.pallas_call(
        gcnjk_kernel,
        out_shape=jax.ShapeDtypeStruct((N, OUT_P), jnp.float32),
        in_specs=[vmem] * 9,
        out_specs=vmem,
        compiler_params=pltpu.CompilerParams(vmem_limit_bytes=32 * 1024 * 1024),
        cost_estimate=cost,
    )(x_p, A, w1_p, g1_p, be1_p, w2_p, b2_p, wf_p, bf_p)

    return out_p[:, :C]


def gcnjk_reference(x, A, params):
    """Module-faithful math (b1 included, BN batch stats, jk max, log_softmax),
    mirroring the kernel's mixed-precision dot policy (bf16 operands, f32 accumulate)."""
    b = lambda t: t.astype(jnp.bfloat16)
    f32 = jnp.float32
    xw = jnp.dot(b(x), b(params["w1"]), preferred_element_type=f32)
    h = jnp.dot(b(A), b(xw), preferred_element_type=f32) + params["b1"]
    mean = jnp.mean(h, axis=0, keepdims=True)
    var = jnp.mean((h - mean) ** 2, axis=0, keepdims=True)
    h = (h - mean) * jax.lax.rsqrt(var + BN_EPS)
    h1 = jnp.maximum(h * params["g1"] + params["be1"], 0.0)
    hw = jnp.dot(b(h1), b(params["w2"]), preferred_element_type=f32)
    h2 = jnp.dot(b(A), b(hw), preferred_element_type=f32) + params["b2"]
    jk = jnp.maximum(h1, h2)
    z = jnp.dot(b(jk), b(params["wf"]), preferred_element_type=f32) + params["bf"]
    return jax.nn.log_softmax(z, axis=1)


if __name__ == "__main__":
    key = jax.random.PRNGKey(0)
    N = 16        # graph nodes
    IN_CH = 8     # in_channels
    HID = 32      # hidden_channels
    OUT_CH = 4    # out_channels

    keys = jax.random.split(key, 10)
    k_x, k_w, k_w1, k_b1, k_g1, k_be1, k_w2, k_b2, k_wf, k_bf = keys

    # node features
    x = jax.random.normal(k_x, (N, IN_CH), dtype=jnp.float32)

    # deterministic edge_index: bidirectional ring + self loops, random positive edge weights
    src = jnp.concatenate([jnp.arange(N), (jnp.arange(N) + 1) % N, jnp.arange(N)])
    dst = jnp.concatenate([(jnp.arange(N) + 1) % N, jnp.arange(N), jnp.arange(N)])
    norm_A = jax.random.uniform(k_w, (src.shape[0],), dtype=jnp.float32, minval=0.1, maxval=1.0)
    A = jnp.zeros((N, N), dtype=jnp.float32).at[dst, src].add(norm_A)

    params = {
        "w1": jax.random.normal(k_w1, (IN_CH, HID), dtype=jnp.float32) * 0.1,
        "b1": jax.random.normal(k_b1, (1, HID), dtype=jnp.float32) * 0.1,   # cancelled by BN
        "g1": 1.0 + 0.1 * jax.random.normal(k_g1, (1, HID), dtype=jnp.float32),
        "be1": 0.1 * jax.random.normal(k_be1, (1, HID), dtype=jnp.float32),
        "w2": jax.random.normal(k_w2, (HID, HID), dtype=jnp.float32) * 0.1,
        "b2": 0.1 * jax.random.normal(k_b2, (1, HID), dtype=jnp.float32),
        "wf": jax.random.normal(k_wf, (HID, OUT_CH), dtype=jnp.float32) * 0.1,
        "bf": 0.1 * jax.random.normal(k_bf, (1, OUT_CH), dtype=jnp.float32),
    }

    out = jax.block_until_ready(gcnjk_forward(x, A, params))
    ref = gcnjk_reference(x, A, params)

    assert out.shape == (N, OUT_CH)
    assert bool(jnp.all(jnp.isfinite(out)))
    assert jnp.allclose(out, ref, atol=2e-3, rtol=2e-3), "mismatch vs pure-JAX reference"

    print("KERNEL_OK")
</pallas_src>

<mosaic_0001>
module attributes {stable_mosaic.version = 11 : i64} {
  func.func @gcnjk_kernel(%arg0: memref<16x128xf32, #tpu.memory_space<vmem>>, %arg1: memref<16x16xf32, #tpu.memory_space<vmem>>, %arg2: memref<128x128xf32, #tpu.memory_space<vmem>>, %arg3: memref<1x128xf32, #tpu.memory_space<vmem>>, %arg4: memref<1x128xf32, #tpu.memory_space<vmem>>, %arg5: memref<128x128xf32, #tpu.memory_space<vmem>>, %arg6: memref<1x128xf32, #tpu.memory_space<vmem>>, %arg7: memref<128x128xf32, #tpu.memory_space<vmem>>, %arg8: memref<1x128xf32, #tpu.memory_space<vmem>>, %arg9: memref<16x128xf32, #tpu.memory_space<vmem>>) attributes {dimension_semantics = [], scalar_prefetch = 0 : i64, scratch_operands = 0 : i64, tpu.core_type = #tpu.core_type<tc>} {
    %c0 = arith.constant 0 : index
    %c0_0 = arith.constant 0 : index
    %0 = vector.load %arg0[%c0, %c0_0] : memref<16x128xf32, #tpu.memory_space<vmem>>, vector<16x128xf32>
    %1 = arith.truncf %0 : vector<16x128xf32> to vector<16x128xbf16>
    %c0_1 = arith.constant 0 : index
    %c0_2 = arith.constant 0 : index
    %2 = vector.load %arg1[%c0_1, %c0_2] : memref<16x16xf32, #tpu.memory_space<vmem>>, vector<16x16xf32>
    %3 = arith.truncf %2 : vector<16x16xf32> to vector<16x16xbf16>
    %c0_3 = arith.constant 0 : index
    %c0_4 = arith.constant 0 : index
    %4 = vector.load %arg2[%c0_3, %c0_4] : memref<128x128xf32, #tpu.memory_space<vmem>>, vector<128x128xf32>
    %5 = arith.truncf %4 : vector<128x128xf32> to vector<128x128xbf16>
    %cst = arith.constant dense<0.000000e+00> : vector<16x128xf32>
    %6 = tpu.matmul %1, %5, %cst {dimension_numbers = #tpu.dot_dimension_numbers<[1], [0], [0], [1], [0, 0, 1, 1], [], []>} : vector<16x128xbf16>, vector<128x128xbf16>, vector<16x128xf32> -> vector<16x128xf32>
    %7 = arith.truncf %6 : vector<16x128xf32> to vector<16x128xbf16>
    %cst_5 = arith.constant dense<0.000000e+00> : vector<16x128xf32>
    %8 = tpu.matmul %3, %7, %cst_5 {dimension_numbers = #tpu.dot_dimension_numbers<[1], [0], [0], [1], [0, 0, 1, 1], [], []>} : vector<16x16xbf16>, vector<16x128xbf16>, vector<16x128xf32> -> vector<16x128xf32>
    %cst_6 = arith.constant 1.000000e+00 : f32
    %9 = vector.broadcast %cst_6 : f32 to vector<8x16xf32>
    %cst_7 = arith.constant dense<0.000000e+00> : vector<8x128xf32>
    %10 = tpu.matmul %9, %8, %cst_7 {dimension_numbers = #tpu.dot_dimension_numbers<[1], [0], [0], [1], [0, 0, 1, 1], [], []>} : vector<8x16xf32>, vector<16x128xf32>, vector<8x128xf32> -> vector<8x128xf32>
    %11 = vector.extract_strided_slice %10 {offsets = [0, 0], sizes = [1, 128], strides = [1, 1]} : vector<8x128xf32> to vector<1x128xf32>
    %12 = arith.mulf %8, %8 : vector<16x128xf32>
    %cst_8 = arith.constant dense<0.000000e+00> : vector<8x128xf32>
    %13 = tpu.matmul %9, %12, %cst_8 {dimension_numbers = #tpu.dot_dimension_numbers<[1], [0], [0], [1], [0, 0, 1, 1], [], []>} : vector<8x16xf32>, vector<16x128xf32>, vector<8x128xf32> -> vector<8x128xf32>
    %14 = vector.extract_strided_slice %13 {offsets = [0, 0], sizes = [1, 128], strides = [1, 1]} : vector<8x128xf32> to vector<1x128xf32>
    %cst_9 = arith.constant 6.250000e-02 : f32
    %15 = vector.broadcast %cst_9 : f32 to vector<1x128xf32>
    %16 = arith.mulf %11, %15 : vector<1x128xf32>
    %cst_10 = arith.constant 6.250000e-02 : f32
    %17 = vector.broadcast %cst_10 : f32 to vector<1x128xf32>
    %18 = arith.mulf %14, %17 : vector<1x128xf32>
    %19 = arith.mulf %16, %16 : vector<1x128xf32>
    %20 = arith.subf %18, %19 : vector<1x128xf32>
    %cst_11 = arith.constant 0.000000e+00 : f32
    %21 = vector.broadcast %cst_11 : f32 to vector<1x128xf32>
    %22 = arith.maximumf %20, %21 : vector<1x128xf32>
    %c0_12 = arith.constant 0 : index
    %c0_13 = arith.constant 0 : index
    %23 = vector.load %arg3[%c0_12, %c0_13] : memref<1x128xf32, #tpu.memory_space<vmem>>, vector<1x128xf32>
    %cst_14 = arith.constant 9.99999974E-6 : f32
    %24 = vector.broadcast %cst_14 : f32 to vector<1x128xf32>
    %25 = arith.addf %22, %24 : vector<1x128xf32>
    %26 = math.rsqrt %25 : vector<1x128xf32>
    %27 = arith.mulf %23, %26 : vector<1x128xf32>
    %c0_15 = arith.constant 0 : index
    %c0_16 = arith.constant 0 : index
    %28 = vector.load %arg4[%c0_15, %c0_16] : memref<1x128xf32, #tpu.memory_space<vmem>>, vector<1x128xf32>
    %29 = arith.mulf %16, %27 : vector<1x128xf32>
    %30 = arith.subf %28, %29 : vector<1x128xf32>
    %31 = vector.broadcast %27 : vector<1x128xf32> to vector<16x128xf32>
    %32 = arith.mulf %8, %31 : vector<16x128xf32>
    %33 = vector.broadcast %30 : vector<1x128xf32> to vector<16x128xf32>
    %34 = arith.addf %32, %33 : vector<16x128xf32>
    %cst_17 = arith.constant 0.000000e+00 : f32
    %35 = vector.broadcast %cst_17 : f32 to vector<16x128xf32>
    %36 = arith.maximumf %34, %35 : vector<16x128xf32>
    %37 = arith.truncf %36 : vector<16x128xf32> to vector<16x128xbf16>
    %c0_18 = arith.constant 0 : index
    %c0_19 = arith.constant 0 : index
    %38 = vector.load %arg5[%c0_18, %c0_19] : memref<128x128xf32, #tpu.memory_space<vmem>>, vector<128x128xf32>
    %39 = arith.truncf %38 : vector<128x128xf32> to vector<128x128xbf16>
    %cst_20 = arith.constant dense<0.000000e+00> : vector<16x128xf32>
    %40 = tpu.matmul %37, %39, %cst_20 {dimension_numbers = #tpu.dot_dimension_numbers<[1], [0], [0], [1], [0, 0, 1, 1], [], []>} : vector<16x128xbf16>, vector<128x128xbf16>, vector<16x128xf32> -> vector<16x128xf32>
    %41 = arith.truncf %40 : vector<16x128xf32> to vector<16x128xbf16>
    %cst_21 = arith.constant dense<0.000000e+00> : vector<16x128xf32>
    %42 = tpu.matmul %3, %41, %cst_21 {dimension_numbers = #tpu.dot_dimension_numbers<[1], [0], [0], [1], [0, 0, 1, 1], [], []>} : vector<16x16xbf16>, vector<16x128xbf16>, vector<16x128xf32> -> vector<16x128xf32>
    %c0_22 = arith.constant 0 : index
    %c0_23 = arith.constant 0 : index
    %43 = vector.load %arg6[%c0_22, %c0_23] : memref<1x128xf32, #tpu.memory_space<vmem>>, vector<1x128xf32>
    %44 = vector.broadcast %43 : vector<1x128xf32> to vector<16x128xf32>
    %45 = arith.addf %42, %44 : vector<16x128xf32>
    %46 = arith.maximumf %36, %45 : vector<16x128xf32>
    %47 = arith.truncf %46 : vector<16x128xf32> to vector<16x128xbf16>
    %c0_24 = arith.constant 0 : index
    %c0_25 = arith.constant 0 : index
    %48 = vector.load %arg7[%c0_24, %c0_25] : memref<128x128xf32, #tpu.memory_space<vmem>>, vector<128x128xf32>
    %49 = arith.truncf %48 : vector<128x128xf32> to vector<128x128xbf16>
    %cst_26 = arith.constant dense<0.000000e+00> : vector<16x128xf32>
    %50 = tpu.matmul %47, %49, %cst_26 {dimension_numbers = #tpu.dot_dimension_numbers<[1], [0], [0], [1], [0, 0, 1, 1], [], []>} : vector<16x128xbf16>, vector<128x128xbf16>, vector<16x128xf32> -> vector<16x128xf32>
    %c0_27 = arith.constant 0 : index
    %c0_28 = arith.constant 0 : index
    %51 = vector.load %arg8[%c0_27, %c0_28] : memref<1x128xf32, #tpu.memory_space<vmem>>, vector<1x128xf32>
    %52 = vector.broadcast %51 : vector<1x128xf32> to vector<16x128xf32>
    %53 = arith.addf %50, %52 : vector<16x128xf32>
    %cst_29 = arith.constant dense<0xFF800000> : vector<16xf32>
    %54 = vector.multi_reduction <maximumf>, %53, %cst_29 [1] : vector<16x128xf32> to vector<16xf32>
    %55 = vector.shape_cast %54 : vector<16xf32> to vector<16x1xf32>
    %56 = vector.broadcast %55 : vector<16x1xf32> to vector<16x128xf32>
    %57 = arith.subf %53, %56 : vector<16x128xf32>
    %58 = math.exp %57 : vector<16x128xf32>
    %cst_30 = arith.constant dense<0.000000e+00> : vector<16xf32>
    %59 = vector.multi_reduction <add>, %58, %cst_30 [1] : vector<16x128xf32> to vector<16xf32>
    %60 = vector.shape_cast %59 : vector<16xf32> to vector<16x1xf32>
    %61 = math.log %60 : vector<16x1xf32>
    %62 = vector.broadcast %61 : vector<16x1xf32> to vector<16x128xf32>
    %63 = arith.subf %57, %62 : vector<16x128xf32>
    %c0_31 = arith.constant 0 : index
    %c0_32 = arith.constant 0 : index
    %64 = vector.load %arg9[%c0_31, %c0_32] : memref<16x128xf32, #tpu.memory_space<vmem>>, vector<16x128xf32>
    tpu.vector_store %arg9[%c0_31, %c0_32], %63 {strides = array<i32>} : memref<16x128xf32, #tpu.memory_space<vmem>>, vector<16x128xf32>,
    return
  }
}

</mosaic_0001>

<bundles_post_ra>
// kernel: tpu_custom_call.1
= control target key start
LH: loop header
LB: loop body
LE: loop exit
PB: predicated region body
PF: predicated region fallthrough
CT: control target
= control target key end

     0   :  { %14 = vsyncpa [#allocation3], 0  ;;  %s1160_s0 = inlined_call_operand.hbm [shape: f32[16,128], index: 0, kind: input, shape index: {}]   ;;  %s1161_s1 = inlined_call_operand.hbm [shape: f32[16,16], index: 1, kind: input, shape index: {}]   ;;  %s1162_s2 = inlined_call_operand.hbm [shape: f32[128,128], index: 2, kind: input, shape index: {}]   ;;  %s1163_s3 = inlined_call_operand.vmem [shape: f32[1,128], index: 3, kind: input, shape index: {}]   ;;  %s1164_s4 = inlined_call_operand.vmem [shape: f32[1,128], index: 4, kind: input, shape index: {}]   ;;  %s1165_s5 = inlined_call_operand.hbm [shape: f32[128,128], index: 5, kind: input, shape index: {}]   ;;  %s1166_s6 = inlined_call_operand.vmem [shape: f32[1,128], index: 6, kind: input, shape index: {}]   ;;  %s1167_s7 = inlined_call_operand.hbm [shape: f32[128,128], index: 7, kind: input, shape index: {}]   ;;  %s1168_s8 = inlined_call_operand.vmem [shape: f32[1,128], index: 8, kind: input, shape index: {}]   ;;  %s1169_s9 = inlined_call_operand.hbm [shape: f32[16,128], index: 9, kind: output, shape index: {}]  }
   0x1   :  { %15 = vsyncpa [#allocation6], 0 }
   0x2   :  { %16 = vsyncpa [#allocation9], 0 }
   0x3   :  { %17 = vsyncpa [#allocation4], 0  ;;  %s922_s30 = smov [#allocation5]   ;;  %s923_s11 = smov [#allocation8]  }
   0x4   :  { %s35_s10 = sshll.u32 %s922_s30, 4  ;;  %s63_s12 = sshll.u32 %s923_s11, 4  ;;  %s36_s10 = int_to_ptr.vmem [resolvable:$true] %s35_s10  ;;  %s984_s12 = int_to_ptr.vmem [resolvable:$true] %s63_s12 }
   0x5   :  { %s782_s15 = scalar_lea.hbm %s1161_s1, 256 }
   0x6   :  { %p783_p0 = scmp.ne.s32.totalorder %s1161_s1, %s782_s15  ;;  %p786_p1 = scmp.lt.u32.totalorder %s782_s15, %s1161_s1 }
   0x8   :  { %p788_p2 = pnand %p786_p1, %p783_p0 }
   0xa   :  { %791 = shalt.err (!%p788_p2)
}
   0xb   :  { %s792_s20 = scalar_lea.vmem %s36_s10, 256  ;;  %p797_p4 = scmp.lt.s32.totalorder %s36_s10, %s36_s10 }
   0xc   :  { %p793_p3 = scmp.ne.s32.totalorder %s36_s10, %s792_s20  ;;  %p798_p5 = scmp.lt.s32.totalorder %s792_s20, %s792_s20 }
   0xe   :  { %p799_p6 = por %p798_p5, %p797_p4 }
  0x10   :  { %p800_p7 = pnand %p799_p6, %p793_p3 }
  0x12   :  { %803 = shalt.err (!%p800_p7)
}
  0x13   :  { %s924_s21 = smov 128   ;;  %s925_s22 = smov 8  }
  0x14   :  { %41 = dma.hbm_to_vmem [thread:$0]  %s1161_s1, 256, %s36_s10, [#allocation6], %s924_s21, %s924_s21, %s925_s22  }
  0x15   :  { %s804_s27 = scalar_lea.hbm %s1165_s5, 2048 }
  0x16   :  { %p805_p8 = scmp.ne.s32.totalorder %s1165_s5, %s804_s27  ;;  %p808_p9 = scmp.lt.u32.totalorder %s804_s27, %s1165_s5 }
  0x18   :  { %p810_p10 = pnand %p808_p9, %p805_p8 }
  0x1a   :  { %813 = shalt.err (!%p810_p10)
}
  0x1b   :  { %s814_s13 = scalar_lea.vmem %s984_s12, 2048  ;;  %p819_p12 = scmp.lt.s32.totalorder %s984_s12, %s984_s12 }
  0x1c   :  { %p815_p11 = scmp.ne.s32.totalorder %s984_s12, %s814_s13  ;;  %p820_p13 = scmp.lt.s32.totalorder %s814_s13, %s814_s13 }
  0x1e   :  { %p821_p0 = por %p820_p13, %p819_p12 }
  0x20   :  { %p822_p1 = pnand %p821_p0, %p815_p11 }
  0x22   :  { %825 = shalt.err (!%p822_p1)
}
  0x23   :  { %69 = dma.hbm_to_vmem [thread:$0]  %s1165_s5, 2048, %s984_s12, [#allocation9], %s924_s21, %s924_s21, %s925_s22  }
  0x24   :  { %s926_s14 = smov [#allocation2]   ;;  %s927_s16 = smov [#allocation7]  }
  0x25   :  { %s23_s15 = sshll.u32 %s926_s14, 4  ;;  %s47_s17 = sshll.u32 %s927_s16, 4  ;;  %s24_s15 = int_to_ptr.vmem [resolvable:$true] %s23_s15  ;;  %s1021_s17 = int_to_ptr.vmem [resolvable:$true] %s47_s17 }
  0x26   :  { %s826_s20 = scalar_lea.hbm %s1160_s0, 256 }
  0x27   :  { %p827_p2 = scmp.ne.s32.totalorder %s1160_s0, %s826_s20  ;;  %p830_p3 = scmp.lt.u32.totalorder %s826_s20, %s1160_s0 }
  0x29   :  { %p832_p4 = pnand %p830_p3, %p827_p2 }
  0x2b   :  { %835 = shalt.err (!%p832_p4)
}
  0x2c   :  { %s836_s5 = scalar_lea.vmem %s24_s15, 256  ;;  %p841_p6 = scmp.lt.s32.totalorder %s24_s15, %s24_s15 }
  0x2d   :  { %p837_p5 = scmp.ne.s32.totalorder %s24_s15, %s836_s5  ;;  %p842_p7 = scmp.lt.s32.totalorder %s836_s5, %s836_s5 }
  0x2f   :  { %p843_p8 = por %p842_p7, %p841_p6 }
  0x31   :  { %p844_p9 = pnand %p843_p8, %p837_p5 }
  0x33   :  { %847 = shalt.err (!%p844_p9)
}
  0x34   :  { %29 = dma.hbm_to_vmem [thread:$0]  %s1160_s0, 256, %s24_s15, [#allocation3], %s924_s21, %s924_s21, %s925_s22  }
  0x35   :  { %s848_s30 = scalar_lea.hbm %s1162_s2, 2048 }
  0x36   :  { %p849_p10 = scmp.ne.s32.totalorder %s1162_s2, %s848_s30  ;;  %p852_p11 = scmp.lt.u32.totalorder %s848_s30, %s1162_s2 }
  0x38   :  { %p854_p12 = pnand %p852_p11, %p849_p10 }
  0x3a   :  { %857 = shalt.err (!%p854_p12)
}
  0x3b   :  { %s858_s14 = scalar_lea.vmem %s1021_s17, 2048  ;;  %p863_p0 = scmp.lt.s32.totalorder %s1021_s17, %s1021_s17 }
  0x3c   :  { %p859_p13 = scmp.ne.s32.totalorder %s1021_s17, %s858_s14  ;;  %p864_p1 = scmp.lt.s32.totalorder %s858_s14, %s858_s14 }
  0x3e   :  { %p865_p2 = por %p864_p1, %p863_p0 }
  0x40   :  { %p866_p3 = pnand %p865_p2, %p859_p13 }
  0x42   :  { %869 = shalt.err (!%p866_p3)
}
  0x43   :  { %53 = dma.hbm_to_vmem [thread:$0]  %s1162_s2, 2048, %s1021_s17, [#allocation6], %s924_s21, %s924_s21, %s925_s22  }
  0x44   :  { %s928_s16 = smov [#allocation10]   ;;  %s870_s23 = scalar_lea.hbm %s1167_s7, 2048 }
  0x45   :  { %s77_s18 = sshll.u32 %s928_s16, 4  ;;  %p871_p4 = scmp.ne.s32.totalorder %s1167_s7, %s870_s23  ;;  %s78_s18 = int_to_ptr.vmem [resolvable:$true] %s77_s18 }
  0x46   :  { %p874_p5 = scmp.lt.u32.totalorder %s870_s23, %s1167_s7 }
  0x48   :  { %p876_p6 = pnand %p874_p5, %p871_p4 }
  0x4a   :  { %879 = shalt.err (!%p876_p6)
}
  0x4b   :  { %s880_s12 = scalar_lea.vmem %s78_s18, 2048  ;;  %p885_p8 = scmp.lt.s32.totalorder %s78_s18, %s78_s18 }
  0x4c   :  { %p881_p7 = scmp.ne.s32.totalorder %s78_s18, %s880_s12  ;;  %p886_p9 = scmp.lt.s32.totalorder %s880_s12, %s880_s12 }
  0x4e   :  { %p887_p10 = por %p886_p9, %p885_p8 }
  0x50   :  { %p888_p11 = pnand %p887_p10, %p881_p7 }
  0x52   :  { %891 = shalt.err (!%p888_p11)
}
  0x53   :  { %83 = dma.hbm_to_vmem [thread:$0]  %s1167_s7, 2048, %s78_s18, [#allocation9], %s924_s21, %s924_s21, %s925_s22  }
  0x54   :  { %914 = dma.done.wait [#allocation3], 256  }
  0x55   :  { %915 = vsyncadd [#allocation3], 4294967040 }
  0x56   :  { %916 = dma.done.wait [#allocation6], 2304  }
  0x57   :  { %917 = vsyncadd [#allocation6], 4294964992 }
  0x58   :  { %918 = dma.done.wait [#allocation9], 4096  }
  0x59   :  { %919 = vsyncadd [#allocation9], 4294963200  ;;  %v929_v0 = vmov 0.0   ;;  %vm930_vm0 = vmmov 0   ;;  %v108_v1 = vld [vmem:[#allocation7] sm:$0xff]  ;;  %v109_v2 = vld [vmem:[#allocation7 + $0x8] sm:$0xff] }
  0x5a   :  { %668 = vmatprep.subr.bf16.mxu0 %v929_v0  ;;  %684 = vmatprep.mubr.msk.bf16.mxu0 %vm930_vm0, %v929_v0  ;;  %v110_v3 = vld [vmem:[#allocation7 + $0x10] sm:$0xff]  ;;  %v124_v4 = vpack.c.bf16 %v109_v2, %v108_v1  ;;  %v111_v5 = vld [vmem:[#allocation7 + $0x18] sm:$0xff]  ;;  %v112_v7 = vld [vmem:[#allocation7 + $0x20] sm:$0xff]  ;;  %vm174_vm1 = vcmask 130048   ;;  %v931_v36 = vmov 0.0|0.0   ;;  %v932_v45 = vmov 1.0  }
  0x5b   :  { %688 = vmatprep.subr.bf16.mxu1 %v929_v0  ;;  %690 = vmatprep.mubr.msk.bf16.mxu1 %vm930_vm0, %v929_v0  ;;  %v125_v6 = vpack.c.bf16 %v111_v5, %v110_v3  ;;  %v113_v8 = vld [vmem:[#allocation7 + $0x28] sm:$0xff]  ;;  %v114_v10 = vld [vmem:[#allocation7 + $0x30] sm:$0xff]  ;;  %v115_v11 = vld [vmem:[#allocation7 + $0x38] sm:$0xff] }
  0x5c   :  { %669 = vmatpush3.bf16.msra.mxu0 %v124_v4  ;;  %v126_v9 = vpack.c.bf16 %v113_v8, %v112_v7  ;;  %v127_v12 = vpack.c.bf16 %v115_v11, %v114_v10  ;;  %v116_v13 = vld [vmem:[#allocation7 + $0x40] sm:$0xff]  ;;  %v117_v14 = vld [vmem:[#allocation7 + $0x48] sm:$0xff]  ;;  %v118_v16 = vld [vmem:[#allocation7 + $0x50] sm:$0xff] }
  0x5d   :  { %670 = vmatprep.subr.bf16.mxu0 %v929_v0  ;;  %v128_v15 = vpack.c.bf16 %v117_v14, %v116_v13  ;;  %v119_v17 = vld [vmem:[#allocation7 + $0x58] sm:$0xff]  ;;  %v120_v19 = vld [vmem:[#allocation7 + $0x60] sm:$0xff]  ;;  %v121_v20 = vld [vmem:[#allocation7 + $0x68] sm:$0xff] }
  0x5e   :  { %v129_v18 = vpack.c.bf16 %v119_v17, %v118_v16  ;;  %v130_v21 = vpack.c.bf16 %v121_v20, %v120_v19  ;;  %v122_v22 = vld [vmem:[#allocation7 + $0x70] sm:$0xff]  ;;  %v123_v23 = vld [vmem:[#allocation7 + $0x78] sm:$0xff]  ;;  %v102_v25 = vld [vmem:[#allocation2] sm:$0xff]  ;;  %v377_v17 = vlaneseq }
  0x5f   :  { %v131_v24 = vpack.c.bf16 %v123_v23, %v122_v22  ;;  %v103_v26 = vld [vmem:[#allocation2 + $0x8] sm:$0xff]  ;;  %v105_v30 = vld [vmem:[#allocation5] sm:$0xff]  ;;  %v106_v31 = vld [vmem:[#allocation5 + $0x8] sm:$0xff] }
  0x60   :  { %671 = vmatpush3.bf16.msra.mxu0 %v125_v6  ;;  %v104_v27 = vpack.c.bf16 %v103_v26, %v102_v25  ;;  %v1089_v35 = vpack.c.bf16 %v106_v31, %v105_v30  ;;  %v395_v46 = vld [vmem:[#allocation8] sm:$0xff]  ;;  %v396_v47 = vld [vmem:[#allocation8 + $0x8] sm:$0xff]  ;;  %v397_v49 = vld [vmem:[#allocation8 + $0x10] sm:$0xff] }
  0x61   :  { %672 = vmatprep.subr.bf16.mxu0 %v929_v0  ;;  %v411_v48 = vpack.c.bf16 %v396_v47, %v395_v46  ;;  %v398_v50 = vld [vmem:[#allocation8 + $0x18] sm:$0xff]  ;;  %v399_v52 = vld [vmem:[#allocation8 + $0x20] sm:$0xff]  ;;  %v400_v53 = vld [vmem:[#allocation8 + $0x28] sm:$0xff] }
  0x62   :  { %v412_v51 = vpack.c.bf16 %v398_v50, %v397_v49  ;;  %v413_v54 = vpack.c.bf16 %v400_v53, %v399_v52  ;;  %v401_v55 = vld [vmem:[#allocation8 + $0x30] sm:$0xff]  ;;  %v402_v56 = vld [vmem:[#allocation8 + $0x38] sm:$0xff]  ;;  %v403_v58 = vld [vmem:[#allocation8 + $0x40] sm:$0xff] }
  0x63   :  { %v414_v57 = vpack.c.bf16 %v402_v56, %v401_v55  ;;  %v404_v59 = vld [vmem:[#allocation8 + $0x48] sm:$0xff]  ;;  %v405_v61 = vld [vmem:[#allocation8 + $0x50] sm:$0xff]  ;;  %v406_v62 = vld [vmem:[#allocation8 + $0x58] sm:$0xff] }
  0x64   :  { %673 = vmatpush3.bf16.msra.mxu0 %v126_v9  ;;  %v415_v60 = vpack.c.bf16 %v404_v59, %v403_v58  ;;  %v407_v63 = vld [vmem:[#allocation8 + $0x60] sm:$0xff]  ;;  %v416_v1 = vpack.c.bf16 %v406_v62, %v405_v61  ;;  %v408_v2 = vld [vmem:[#allocation8 + $0x68] sm:$0xff]  ;;  %v409_v4 = vld [vmem:[#allocation8 + $0x70] sm:$0xff] }
  0x65   :  { %674 = vmatprep.subr.bf16.mxu0 %v929_v0  ;;  %v417_v3 = vpack.c.bf16 %v408_v2, %v407_v63  ;;  %v410_v5 = vld [vmem:[#allocation8 + $0x78] sm:$0xff]  ;;  %v369_v19 = vld [vmem:[%s1163_s3] sm:$0x1]  ;;  %v521_v49 = vld [vmem:[#allocation10 + $0x48] sm:$0xff] }
  0x66   :  { %v418_v6 = vpack.c.bf16 %v410_v5, %v409_v4  ;;  %v373_v23 = vld [vmem:[%s1164_s4] sm:$0x1]  ;;  %v519_v46 = vld [vmem:[#allocation10 + $0x38] sm:$0xff]  ;;  %v526_v62 = vld [vmem:[#allocation10 + $0x70] sm:$0xff] }
  0x67   :  { %v523_v52 = vld [vmem:[#allocation10 + $0x58] sm:$0xff]  ;;  %v524_v59 = vld [vmem:[#allocation10 + $0x60] sm:$0xff] }
  0x68   :  { %675 = vmatpush3.bf16.msra.mxu0 %v127_v12  ;;  %v527_v63 = vld [vmem:[#allocation10 + $0x78] sm:$0xff]  ;;  %v628_v2 = vld [vmem:[%s1166_s6] ss:$0 sm:$0xff]  ;;  %s933_s6 = smov [#allocation11]  }
  0x69   :  { %676 = vmatprep.subr.bf16.mxu0 %v929_v0 }
  0x6c   :  { %677 = vmatpush3.bf16.msra.mxu0 %v128_v15 }
  0x6d   :  { %678 = vmatprep.subr.bf16.mxu0 %v929_v0 }
  0x70   :  { %679 = vmatpush3.bf16.msra.mxu0 %v129_v18  ;;  %v378_v18 = vshrl.u32 %v377_v17, 7 }
  0x71   :  { %680 = vmatprep.subr.bf16.mxu0 %v929_v0 }
  0x72   :  { %v379_v20 = vsub.s32 0, %v378_v18 }
  0x74   :  { %681 = vmatpush3.bf16.msra.mxu0 %v130_v21 }
  0x75   :  { %682 = vmatprep.subr.bf16.mxu0 %v929_v0 }
  0x78   :  { %683 = vmatpush3.bf16.msra.mxu0 %v131_v24 }
  0x79   :  { %734 = vmatprep.subr.bf16.mxu0 %v929_v0 }
  0x7b   :  { %685 = vmatmul.mubr.bf16.vlgmr.msra.gmra.mrb[0].mxu0 %v104_v27 }
  0x7c   :  { %750 = vmatprep.mubr.msk.bf16.mxu0 %vm930_vm0, %v929_v0 }
 0x14e   :  { %v166_v28 = vpop.f32.mrb[0].mxu0 }
 0x14f   :  { %v686_v29 = vpop.f32.mrb[1].mxu0 }
 0x150   :  { %v169_v32 = vpop.f32.mrb[2].mxu0 }
 0x151   :  { %v173_v33 = vpack.c.bf16 %v169_v32, %v166_v28  ;;  %v687_v34 = vpop.f32.mrb[3].mxu0 }
 0x153   :  { %689 = vmatpush3.bf16.msra.mxu1 %v173_v33 }
 0x154   :  { %754 = vmatprep.subr.bf16.mxu1 %v931_v36 }
 0x156   :  { %691 = vmatmul.mubr.msk.bf16.vlgmr.msra.gmra.mrb[0].mxu1 %vm174_vm1, %v1089_v35 }
 0x157   :  { %698 = vmatprep.mubr.msk.f32.mxu1 %vm930_vm0, %v929_v0 }
 0x229   :  { %v1095_v37 = vpop.f32.mrb[0].mxu1 }
 0x22a   :  { %v692_v38 = vpop.f32.mrb[1].mxu1  ;;  %v292_v40 = vmul.f32 %v1095_v37, %v1095_v37 }
 0x22b   :  { %v1097_v39 = vpop.f32.mrb[2].mxu1  ;;  %v513_v38 = vld [vmem:[#allocation10 + $0x8] sm:$0xff] }
 0x22c   :  { %v755_v41 = vpack.c.bf16 %v1097_v39, %v1095_v37  ;;  %v293_v42 = vmul.f32 %v1097_v39, %v1097_v39  ;;  %v693_v43 = vpop.f32.mrb[3].mxu1 }
 0x22e   :  { %v758_v44 = vpack.c.bf16 %v293_v42, %v292_v40  ;;  %756 = vmatpush3.bf16.msra.mxu1 %v755_v41  ;;  %v514_v40 = vld [vmem:[#allocation10 + $0x10] sm:$0xff]  ;;  %v515_v42 = vld [vmem:[#allocation10 + $0x18] sm:$0xff] }
 0x22f   :  { %757 = vmatprep.subr.bf16.mxu1 %v931_v36  ;;  %v512_v36 = vld [vmem:[#allocation10] sm:$0xff]  ;;  %v529_v43 = vpack.c.bf16 %v515_v42, %v514_v40 }
 0x230   :  { %v528_v41 = vpack.c.bf16 %v513_v38, %v512_v36 }
 0x231   :  { %699 = vmatmul.mubr.msk.f32.vlgmr.msra.gmra.mrb[4].mxu1 %vm174_vm1, %v932_v45 }
 0x232   :  { %759 = vmatpush3.bf16.msra.mxu1 %v758_v44  ;;  %705 = vmatprep.mubr.msk.f32.mxu1 %vm930_vm0, %v929_v0 }
 0x233   :  { %708 = vmatprep.subr.bf16.mxu1 %v929_v0  ;;  %735 = vmatpush3.bf16.msra.mxu0 %v528_v41 }
 0x234   :  { %736 = vmatprep.subr.bf16.mxu0 %v929_v0 }
 0x235   :  { %706 = vmatmul.mubr.msk.f32.vlgmr.msra.gmra.mrb[6].mxu1 %vm174_vm1, %v932_v45  ;;  %v518_v45 = vld [vmem:[#allocation10 + $0x30] sm:$0xff] }
 0x236   :  { %724 = vmatprep.mubr.msk.bf16.mxu1 %vm930_vm0, %v929_v0  ;;  %709 = vmatpush3.bf16.msra.mxu1 %v411_v48  ;;  %v531_v47 = vpack.c.bf16 %v519_v46, %v518_v45  ;;  %v520_v48 = vld [vmem:[#allocation10 + $0x40] sm:$0xff] }
 0x237   :  { %710 = vmatprep.subr.bf16.mxu1 %v929_v0  ;;  %737 = vmatpush3.bf16.msra.mxu0 %v529_v43  ;;  %v532_v50 = vpack.c.bf16 %v521_v49, %v520_v48 }
 0x238   :  { %738 = vmatprep.subr.bf16.mxu0 %v929_v0 }
 0x23a   :  { %711 = vmatpush3.bf16.msra.mxu1 %v412_v51  ;;  %v522_v51 = vld [vmem:[#allocation10 + $0x50] sm:$0xff] }
 0x23b   :  { %712 = vmatprep.subr.bf16.mxu1 %v929_v0  ;;  %v533_v53 = vpack.c.bf16 %v523_v52, %v522_v51 }
 0x23e   :  { %713 = vmatpush3.bf16.msra.mxu1 %v413_v54 }
 0x23f   :  { %714 = vmatprep.subr.bf16.mxu1 %v929_v0 }
 0x242   :  { %715 = vmatpush3.bf16.msra.mxu1 %v414_v57 }
 0x243   :  { %716 = vmatprep.subr.bf16.mxu1 %v929_v0 }
 0x246   :  { %717 = vmatpush3.bf16.msra.mxu1 %v415_v60  ;;  %v525_v60 = vld [vmem:[#allocation10 + $0x68] sm:$0xff] }
 0x247   :  { %718 = vmatprep.subr.bf16.mxu1 %v929_v0  ;;  %v534_v61 = vpack.c.bf16 %v525_v60, %v524_v59 }
 0x24a   :  { %719 = vmatpush3.bf16.msra.mxu1 %v416_v1  ;;  %v535_v1 = vpack.c.bf16 %v527_v63, %v526_v62 }
 0x24b   :  { %720 = vmatprep.subr.bf16.mxu1 %v929_v0 }
 0x24e   :  { %721 = vmatpush3.bf16.msra.mxu1 %v417_v3 }
 0x24f   :  { %722 = vmatprep.subr.bf16.mxu1 %v929_v0 }
 0x252   :  { %723 = vmatpush3.bf16.msra.mxu1 %v418_v6 }
 0x253   :  { %728 = vmatprep.subr.bf16.mxu1 %v929_v0 }
 0x304   :  { %v288_v7 = vpop.f32.mrb[4].mxu1 }
 0x305   :  { %v364_v8 = vmul.f32 0.0625, %v288_v7  ;;  %v700_v9 = vpop.f32.mrb[5].mxu1 }
 0x307   :  { %v366_v11 = vmul.f32 %v364_v8, %v364_v8 }
 0x308   :  { %v360_v10 = vpop.f32.mrb[6].mxu1 }
 0x309   :  { %v365_v12 = vmul.f32 0.0625, %v360_v10  ;;  %v707_v13 = vpop.f32.mrb[7].mxu1 }
 0x30b   :  { %v367_v14 = vsub.f32 %v365_v12, %v366_v11 }
 0x30d   :  { %v368_v15 = vmax.f32 %v367_v14, 0.0 }
 0x30f   :  { %v370_v16 = vadd.f32 1e-05, %v368_v15 }
 0x311   :  { %772 = vrsqrt.f32 %v370_v16 }
 0x31b   :  { %v773_v21 = vpop.eup %772 }
 0x31c   :  { %v372_v22 = vmul.f32 %v773_v21, %v369_v19 }
 0x31e   :  { %v374_v24 = vmul.f32 %v372_v22, %v364_v8  ;;  %v380_v25 = vrot.slane %v372_v22, %v379_v20 }
 0x320   :  { %v375_v26 = vsub.f32 %v373_v23, %v374_v24  ;;  %v382_v27 = vmul.f32 %v380_v25, %v1095_v37  ;;  %v383_v28 = vmul.f32 %v380_v25, %v1097_v39  ;;  %v516_v37 = vld [vmem:[#allocation10 + $0x20] sm:$0xff]  ;;  %v517_v39 = vld [vmem:[#allocation10 + $0x28] sm:$0xff] }
 0x321   :  { %v530_v44 = vpack.c.bf16 %v517_v39, %v516_v37 }
 0x322   :  { %v388_v29 = vrot.slane %v375_v26, %v379_v20 }
 0x323   :  { %739 = vmatpush3.bf16.msra.mxu0 %v530_v44 }
 0x324   :  { %v390_v30 = vadd.f32 %v388_v29, %v382_v27  ;;  %v391_v31 = vadd.f32 %v388_v29, %v383_v28  ;;  %740 = vmatprep.subr.bf16.mxu0 %v929_v0 }
 0x326   :  { %v392_v32 = vmax.f32 %v390_v30, 0.0  ;;  %v393_v33 = vmax.f32 %v391_v31, 0.0 }
 0x327   :  { %741 = vmatpush3.bf16.msra.mxu0 %v531_v47 }
 0x328   :  { %v394_v34 = vpack.c.bf16 %v393_v33, %v392_v32  ;;  %742 = vmatprep.subr.bf16.mxu0 %v929_v0 }
 0x32a   :  { %725 = vmatmul.mubr.bf16.vlgmr.msra.gmra.mrb[8].mxu1 %v394_v34 }
 0x32b   :  { %730 = vmatprep.mubr.msk.bf16.mxu1 %vm930_vm0, %v929_v0  ;;  %743 = vmatpush3.bf16.msra.mxu0 %v532_v50 }
 0x32c   :  { %744 = vmatprep.subr.bf16.mxu0 %v929_v0 }
 0x32f   :  { %745 = vmatpush3.bf16.msra.mxu0 %v533_v53 }
 0x330   :  { %746 = vmatprep.subr.bf16.mxu0 %v929_v0 }
 0x333   :  { %747 = vmatpush3.bf16.msra.mxu0 %v534_v61 }
 0x334   :  { %748 = vmatprep.subr.bf16.mxu0 %v929_v0  ;;  %v630_v0 = vld [vmem:[%s1168_s8] ss:$0 sm:$0xff]  ;;  %s611_s8 = sshll.u32 %s933_s6, 4  ;;  %s612_s8 = int_to_ptr.vmem [resolvable:$true] %s611_s8 }
 0x335   :  { %s892_s13 = scalar_lea.vmem %s612_s8, 256  ;;  %p897_p13 = scmp.lt.s32.totalorder %s612_s8, %s612_s8 }
 0x336   :  { %p893_p12 = scmp.ne.s32.totalorder %s612_s8, %s892_s13  ;;  %p898_p0 = scmp.lt.s32.totalorder %s892_s13, %s892_s13 }
 0x337   :  { %749 = vmatpush3.bf16.msra.mxu0 %v535_v1 }
 0x338   :  { %p899_p1 = por %p898_p0, %p897_p13 }
 0x33a   :  { %p900_p2 = pnand %p899_p1, %p893_p12 }
 0x3fd   :  { %v453_v54 = vpop.f32.mrb[8].mxu1 }
 0x3fe   :  { %v726_v55 = vpop.f32.mrb[9].mxu1 }
 0x3ff   :  { %v456_v56 = vpop.f32.mrb[10].mxu1 }
 0x400   :  { %v460_v57 = vpack.c.bf16 %v456_v56, %v453_v54  ;;  %v727_v58 = vpop.f32.mrb[11].mxu1 }
 0x402   :  { %729 = vmatpush3.bf16.msra.mxu1 %v460_v57 }
 0x405   :  { %731 = vmatmul.mubr.msk.bf16.vlgmr.msra.gmra.mrb[12].mxu1 %vm174_vm1, %v1089_v35 }
 0x4d8   :  { %v502_v3 = vpop.f32.mrb[12].mxu1 }
 0x4d9   :  { %v503_v4 = vadd.f32 %v628_v2, %v502_v3  ;;  %v732_v5 = vpop.f32.mrb[13].mxu1 }
 0x4da   :  { %v505_v6 = vpop.f32.mrb[14].mxu1 }
 0x4db   :  { %v506_v7 = vadd.f32 %v628_v2, %v505_v6  ;;  %v733_v35 = vpop.f32.mrb[15].mxu1  ;;  %v509_v8 = vmax.f32 %v392_v32, %v503_v4 }
 0x4dd   :  { %v510_v9 = vmax.f32 %v393_v33, %v506_v7 }
 0x4df   :  { %v511_v10 = vpack.c.bf16 %v510_v9, %v509_v8 }
 0x4e1   :  { %751 = vmatmul.mubr.bf16.vlgmr.msra.gmra.mrb[4].mxu0 %v511_v10 }
 0x5b4   :  { %v577_v11 = vpop.f32.mrb[4].mxu0 }
 0x5b5   :  { %v578_v12 = vadd.f32 %v630_v0, %v577_v11  ;;  %v752_v13 = vpop.f32.mrb[5].mxu0 }
 0x5b6   :  { %v580_v14 = vpop.f32.mrb[6].mxu0 }
 0x5b7   :  { %584 = vmax.xlane.f32.xlu0 %v578_v12  ;;  %v753_v15 = vpop.f32.mrb[7].mxu0  ;;  %v581_v16 = vadd.f32 %v630_v0, %v580_v14 }
 0x5bb   :  { %586 = vmax.xlane.f32.xlu0 %v581_v16 }
 0x644   :  { %v585_v17 = vpop.xlane.xlu0 %584 }
 0x645   :  { %v588_v18 = vsub.f32 %v578_v12, %v585_v17 }
 0x647   :  { %v590_v19 = vmul.f32 1.442695, %v588_v18 }
 0x648   :  { %v587_v20 = vpop.xlane.xlu0 %586 }
 0x649   :  { %v589_v21 = vsub.f32 %v581_v16, %v587_v20  ;;  %774 = vpow2.f32 %v590_v19 }
 0x64b   :  { %v592_v22 = vmul.f32 1.442695, %v589_v21 }
 0x64d   :  { %776 = vpow2.f32 %v592_v22 }
 0x653   :  { %v775_v23 = vpop.eup %774 }
 0x654   :  { %594 = vadd.xlane.f32.xlu1 %v775_v23 }
 0x657   :  { %v777_v24 = vpop.eup %776 }
 0x658   :  { %596 = vadd.xlane.f32.xlu1 %v777_v24 }
 0x6e1   :  { %v595_v25 = vpop.xlane.xlu1 %594 }
 0x6e2   :  { %778 = vlog2.f32 %v595_v25 }
 0x6e5   :  { %v597_v26 = vpop.xlane.xlu1 %596 }
 0x6e6   :  { %780 = vlog2.f32 %v597_v26 }
 0x6ec   :  { %v779_v27 = vpop.eup %778 }
 0x6ed   :  { %v599_v28 = vmul.f32 0.6931472, %v779_v27 }
 0x6ef   :  { %v602_v29 = vsub.f32 %v588_v18, %v599_v28 }
 0x6f0   :  { %v781_v30 = vpop.eup %780 }
 0x6f1   :  { %604 = vst [vmem:[#allocation11] sm:$0xff] %v602_v29  ;;  %v601_v31 = vmul.f32 0.6931472, %v781_v30 }
 0x6f3   :  { %v603_v32 = vsub.f32 %v589_v21, %v601_v31 }
 0x6f5   :  { %605 = vst [vmem:[#allocation11 + $0x8] sm:$0xff] %v603_v32 }
 0x6f6   :  { %903 = shalt.err (!%p900_p2)
}
 0x6f7   :  { %s904_s14 = scalar_lea.hbm %s1169_s9, 256 }
 0x6f8   :  { %p905_p3 = scmp.ne.s32.totalorder %s1169_s9, %s904_s14  ;;  %p908_p4 = scmp.lt.u32.totalorder %s904_s14, %s1169_s9 }
 0x6fa   :  { %p910_p5 = pnand %p908_p4, %p905_p3 }
 0x6fc   :  { %913 = shalt.err (!%p910_p5)
}
 0x6fd   :  { %617 = dma.vmem_to_hbm [thread:$0]  %s612_s8, 256, %s1169_s9, [#allocation4], %s924_s21, %s924_s21, %s925_s22  }
 0x6fe   :  { %920 = dma.done.wait [#allocation4], 256  }
 0x6ff   :  { %921 = vsyncadd [#allocation4], 4294967040 }
 0x700   :  { %621 = vsyncpa [#allocation3], 1 }
 0x701   :  { %622 = vsyncpa [#allocation6], 1 }
 0x702   :  { %623 = vsyncpa [#allocation9], 1 }
 0x703   :  { %624 = vsyncpa [#allocation4], 1 }

</bundles_post_ra>
